<compile_context>
chip_gen: v6e
topology: v6e:2x2x1
jax: 0.10.0
libtpu: 0.0.40
codegen_flags: <defaults>
</compile_context>

<pallas_src>
import math

import jax
import jax.numpy as jnp
from jax import lax
from jax.experimental import pallas as pl
from jax.experimental.pallas import tpu as pltpu

INPUT_DIM = 768
DEC_HIDDEN = 400
H1 = DEC_HIDDEN // 2   # 200
H2 = DEC_HIDDEN // 4   # 100
Y_CLASSES = 10
Z_CLASSES = 15
BN_EPS = 1e-5

# Lane-padded hidden dims (multiples of 128 -> lane-dense vregs / MXU tiles).
H1_PAD = 256
H2_PAD = 128

_INV_SQRT2 = 1.0 / math.sqrt(2.0)

# HBM-bound kernel: 2048-row tiles reach ~roofline on v5e/v6e while a bf16
# double-buffered (2048, 768) input tile (~6 MiB) stays far under v7x's 64 MiB VMEM.
MAX_BLOCK_BATCH = 2048
COMPUTE_DTYPE = jnp.bfloat16


def _gelu_exact(x):
    # PyTorch nn.GELU default: 0.5 * x * (1 + erf(x / sqrt(2))); kept exact (f32) for parity.
    return 0.5 * x * (1.0 + lax.erf(x * _INV_SQRT2))


# ----------------------------------------------------------------------------- kernels
def decoder_kernel(x_ref, w1_ref, b1_ref, w2_ref, b2_ref, w3_ref, b3_ref, out_ref):
    h = jnp.dot(x_ref[...], w1_ref[...], preferred_element_type=jnp.float32) + b1_ref[...]
    h = _gelu_exact(h)
    h = jnp.dot(h.astype(w2_ref.dtype), w2_ref[...],
                preferred_element_type=jnp.float32) + b2_ref[...]
    h = _gelu_exact(h)
    out = jnp.dot(h.astype(w3_ref.dtype), w3_ref[...],
                  preferred_element_type=jnp.float32) + b3_ref[...]
    out_ref[...] = out.astype(out_ref.dtype)


def decoder_kernel_with_z(x_ref, z_ref, w1_ref, b1_ref, w2_ref, b2_ref,
                          w3_ref, wz_ref, b3z_ref, out_ref):
    h = jnp.dot(x_ref[...], w1_ref[...], preferred_element_type=jnp.float32) + b1_ref[...]
    h = _gelu_exact(h)
    h = jnp.dot(h.astype(w2_ref.dtype), w2_ref[...],
                preferred_element_type=jnp.float32) + b2_ref[...]
    h = _gelu_exact(h)
    out = (jnp.dot(h.astype(w3_ref.dtype), w3_ref[...], preferred_element_type=jnp.float32)
           + jnp.dot(z_ref[...], wz_ref[...], preferred_element_type=jnp.float32)
           + b3z_ref[...])      # b3z = b3 + bz, folded on host
    out_ref[...] = out.astype(out_ref.dtype)


# ------------------------------------------------------------------ host-side param prep
def _pad_cols(a, n):
    return jnp.pad(a, ((0, 0), (0, n - a.shape[1])))


def _pad_rows(a, n):
    return jnp.pad(a, ((0, n - a.shape[0]), (0, 0)))


def prepare_params(params, compute_dtype=COMPUTE_DTYPE):
    """Fold eval-mode BatchNorm into the preceding Linear, pad hidden dims to lane
    multiples, and cast matmul weights to the MXU compute dtype (biases stay f32)."""
    s1 = params["g1"] * lax.rsqrt(params["rv1"] + BN_EPS)                  # (1, H1)
    w1 = params["w1"] * s1                                                  # (768, H1)
    b1 = (params["b1"] - params["rm1"]) * s1 + params["be1"]                # (1, H1)
    s2 = params["g2"] * lax.rsqrt(params["rv2"] + BN_EPS)
    w2 = params["w2"] * s2
    b2 = (params["b2"] - params["rm2"]) * s2 + params["be2"]

    w1p = _pad_cols(w1, H1_PAD).astype(compute_dtype)                       # (768, 256) bf16
    b1p = _pad_cols(b1, H1_PAD).astype(jnp.float32)                         # (1, 256)   f32
    w2p = _pad_cols(_pad_rows(w2, H1_PAD), H2_PAD).astype(compute_dtype)    # (256, 128) bf16
    b2p = _pad_cols(b2, H2_PAD).astype(jnp.float32)                         # (1, 128)   f32
    w3p = _pad_rows(params["w3"], H2_PAD).astype(compute_dtype)             # (128, 10)  bf16
    b3p = params["b3"].astype(jnp.float32)                                  # (1, 10)    f32
    wzp = params["wz"].astype(compute_dtype)                                # (15, 10)   bf16
    b3z = (params["b3"] + params["bz"]).astype(jnp.float32)                 # (1, 10)    f32

    return dict(w1=w1p, b1=b1p, w2=w2p, b2=b2p, w3=w3p, b3=b3p, wz=wzp, b3z=b3z)


# --------------------------------------------------------------------------- entry point
def _round_up(x, m):
    return ((x + m - 1) // m) * m


def _resident_spec(arr):
    """Weight/bias stays pinned in VMEM for the whole grid (constant index_map)."""
    return pl.BlockSpec(arr.shape, lambda i: (0, 0))


def decoder_ztoy_forward(encoded, prepared, zbar=None, *, block_batch=None):
    """Pallas forward of Decoder_ZtoY (eval mode).

    encoded: (B, 768) f32; zbar: (B, 15) f32 or None; prepared: prepare_params(...) output.
    Returns (B, 10) f32.
    """
    batch = encoded.shape[0]
    if block_batch is None:
        # >=2 tiles when possible (v7x has 2 TCs under dimension_semantics="parallel"),
        # capped so the double-buffered bf16 input tile stays small in VMEM.
        block_batch = min(MAX_BLOCK_BATCH, _round_up(max(pl.cdiv(batch, 2), 1), 16))
    tb = block_batch
    assert tb % 16 == 0, "batch tile must be a multiple of 16 (bf16 sublane packing)"
    grid = (pl.cdiv(batch, tb),)

    # Stream activations in bf16 (halves the dominant HBM traffic; native MXU dtype).
    x = encoded.astype(COMPUTE_DTYPE)
    x_spec = pl.BlockSpec((tb, INPUT_DIM), lambda i: (i, 0))
    # Direct (B, 10) output: last dim == full array dim is a legal block; avoids the
    # padded-output + wrapper-slice HBM round trip.
    out_spec = pl.BlockSpec((tb, Y_CLASSES), lambda i: (i, 0))
    out_shape = jax.ShapeDtypeStruct((batch, Y_CLASSES), jnp.float32)

    if zbar is None:
        kernel = decoder_kernel
        weights = (prepared["w1"], prepared["b1"], prepared["w2"], prepared["b2"],
                   prepared["w3"], prepared["b3"])
        args = (x,) + weights
        in_specs = [x_spec] + [_resident_spec(w) for w in weights]
    else:
        kernel = decoder_kernel_with_z
        weights = (prepared["w1"], prepared["b1"], prepared["w2"], prepared["b2"],
                   prepared["w3"], prepared["wz"], prepared["b3z"])
        z = zbar.astype(COMPUTE_DTYPE)
        args = (x, z) + weights
        z_spec = pl.BlockSpec((tb, Z_CLASSES), lambda i: (i, 0))
        in_specs = [x_spec, z_spec] + [_resident_spec(w) for w in weights]

    # ---- advisory cost estimate & need-based VMEM budget ---------------------------
    param_bytes = sum(int(w.size) * w.dtype.itemsize for w in weights)
    flops = 2 * batch * (INPUT_DIM * H1_PAD + H1_PAD * H2_PAD + H2_PAD * Y_CLASSES)
    bytes_accessed = 2 * batch * INPUT_DIM + 4 * batch * Y_CLASSES + param_bytes
    if zbar is not None:
        flops += 2 * batch * Z_CLASSES * Y_CLASSES
        bytes_accessed += 2 * batch * Z_CLASSES
    cost = pl.CostEstimate(flops=int(flops),
                           transcendentals=int(batch * (H1_PAD + H2_PAD)),
                           bytes_accessed=int(bytes_accessed))

    vmem_need = (2 * tb * INPUT_DIM * 2                 # double-buffered bf16 input tile
                 + 2 * tb * Z_CLASSES * 2               # double-buffered bf16 zbar tile
                 + 2 * tb * Y_CLASSES * 4               # double-buffered f32 output tile
                 + 2 * param_bytes                      # resident weights/biases (2 bufs)
                 + tb * (H1_PAD + H2_PAD) * 4 * 2)      # f32 intermediates (+slack)
    # Need-based limit with headroom; never request the full physical VMEM (v7x: 64 MiB).
    vmem_limit = int(min(max(2 * vmem_need, 16 << 20), 48 << 20))

    return pl.pallas_call(
        kernel,
        out_shape=out_shape,
        grid=grid,
        in_specs=in_specs,
        out_specs=out_spec,
        compiler_params=pltpu.CompilerParams(
            dimension_semantics=("parallel",),
            vmem_limit_bytes=vmem_limit),
        cost_estimate=cost,
    )(*args)


# --------------------------------------------------------------------- params & reference
def _linear_init(key, fan_in, fan_out):
    """PyTorch nn.Linear default init: U(-1/sqrt(fan_in), 1/sqrt(fan_in))."""
    kw, kb = jax.random.split(key)
    bound = 1.0 / math.sqrt(fan_in)
    w = jax.random.uniform(kw, (fan_in, fan_out), jnp.float32, -bound, bound)
    b = jax.random.uniform(kb, (1, fan_out), jnp.float32, -bound, bound)
    return w, b


def make_params(key):
    ks = jax.random.split(key, 12)
    w1, b1 = _linear_init(ks[0], INPUT_DIM, H1)
    w2, b2 = _linear_init(ks[1], H1, H2)
    w3, b3 = _linear_init(ks[2], H2, Y_CLASSES)
    wz, bz = _linear_init(ks[3], Z_CLASSES, Y_CLASSES)
    # BatchNorm affine + running stats (deterministic but non-trivial).
    g1 = 1.0 + 0.05 * jax.random.normal(ks[4], (1, H1), jnp.float32)
    be1 = 0.05 * jax.random.normal(ks[5], (1, H1), jnp.float32)
    rm1 = 0.1 * jax.random.normal(ks[6], (1, H1), jnp.float32)
    rv1 = 1.0 + 0.1 * jax.random.uniform(ks[7], (1, H1), jnp.float32)
    g2 = 1.0 + 0.05 * jax.random.normal(ks[8], (1, H2), jnp.float32)
    be2 = 0.05 * jax.random.normal(ks[9], (1, H2), jnp.float32)
    rm2 = 0.1 * jax.random.normal(ks[10], (1, H2), jnp.float32)
    rv2 = 1.0 + 0.1 * jax.random.uniform(ks[11], (1, H2), jnp.float32)
    return dict(w1=w1, b1=b1, g1=g1, be1=be1, rm1=rm1, rv1=rv1,
                w2=w2, b2=b2, g2=g2, be2=be2, rm2=rm2, rv2=rv2,
                w3=w3, b3=b3, wz=wz, bz=bz)


def _bn_eval(x, gamma, beta, rmean, rvar):
    return (x - rmean) * lax.rsqrt(rvar + BN_EPS) * gamma + beta


def _reference(encoded, params, zbar=None):
    """Pure-JAX f32 reference (un-folded, un-padded) for a sanity check."""
    h = encoded @ params["w1"] + params["b1"]
    h = _gelu_exact(_bn_eval(h, params["g1"], params["be1"], params["rm1"], params["rv1"]))
    h = h @ params["w2"] + params["b2"]
    h = _gelu_exact(_bn_eval(h, params["g2"], params["be2"], params["rm2"], params["rv2"]))
    out = h @ params["w3"] + params["b3"]
    if zbar is not None:
        out = out + (zbar @ params["wz"] + params["bz"])
    return out


if __name__ == "__main__":
    key = jax.random.PRNGKey(0)
    k_params, k_x, k_z = jax.random.split(key, 3)

    batch = 32   # small test shape; default tile = 16 -> 2 grid steps
    encoded = jax.random.normal(k_x, (batch, INPUT_DIM), jnp.float32)
    zbar = jax.random.normal(k_z, (batch, Z_CLASSES), jnp.float32)

    params = make_params(k_params)
    prepared = prepare_params(params)

    # Case 1: zbar is None
    out_a = jax.block_until_ready(decoder_ztoy_forward(encoded, prepared, zbar=None))
    # Case 2: zbar provided
    out_b = jax.block_until_ready(decoder_ztoy_forward(encoded, prepared, zbar=zbar))

    ref_a = _reference(encoded, params, zbar=None)
    ref_b = _reference(encoded, params, zbar=zbar)

    assert out_a.shape == (batch, Y_CLASSES) and out_b.shape == (batch, Y_CLASSES)
    # bf16 matmul operands (f32 accumulate) -> relaxed tolerance vs the f32 reference.
    err_a = float(jnp.max(jnp.abs(out_a - ref_a)))
    err_b = float(jnp.max(jnp.abs(out_b - ref_b)))
    assert jnp.allclose(out_a, ref_a, atol=5e-2, rtol=5e-2), f"max abs err (no z): {err_a}"
    assert jnp.allclose(out_b, ref_b, atol=5e-2, rtol=5e-2), f"max abs err (with z): {err_b}"

    print("KERNEL_OK")
</pallas_src>

<mosaic_0001>
module attributes {stable_mosaic.version = 11 : i64} {
  func.func @decoder_kernel(%arg0: i32, %arg1: memref<16x768xbf16, #tpu.memory_space<vmem>>, %arg2: memref<768x256xbf16, #tpu.memory_space<vmem>>, %arg3: memref<1x256xf32, #tpu.memory_space<vmem>>, %arg4: memref<256x128xbf16, #tpu.memory_space<vmem>>, %arg5: memref<1x128xf32, #tpu.memory_space<vmem>>, %arg6: memref<128x10xbf16, #tpu.memory_space<vmem>>, %arg7: memref<1x10xf32, #tpu.memory_space<vmem>>, %arg8: memref<16x10xf32, #tpu.memory_space<vmem>>) attributes {dimension_semantics = [#tpu.dimension_semantics<parallel>], iteration_bounds = array<i64: 2>, scalar_prefetch = 0 : i64, scratch_operands = 0 : i64, tpu.core_type = #tpu.core_type<tc>, window_params = [{transform_indices = @transform_0, window_bounds = array<i64: 16, 768>}, {pipeline_mode = #tpu.pipeline_mode<synchronous>, transform_indices = @transform_1, window_bounds = array<i64: 768, 256>}, {pipeline_mode = #tpu.pipeline_mode<synchronous>, transform_indices = @transform_2, window_bounds = array<i64: 1, 256>}, {pipeline_mode = #tpu.pipeline_mode<synchronous>, transform_indices = @transform_3, window_bounds = array<i64: 256, 128>}, {pipeline_mode = #tpu.pipeline_mode<synchronous>, transform_indices = @transform_4, window_bounds = array<i64: 1, 128>}, {pipeline_mode = #tpu.pipeline_mode<synchronous>, transform_indices = @transform_5, window_bounds = array<i64: 128, 10>}, {pipeline_mode = #tpu.pipeline_mode<synchronous>, transform_indices = @transform_6, window_bounds = array<i64: 1, 10>}, {transform_indices = @transform_7, window_bounds = array<i64: 16, 10>}]} {
    %c0 = arith.constant 0 : index
    %c0_0 = arith.constant 0 : index
    %0 = vector.load %arg1[%c0, %c0_0] : memref<16x768xbf16, #tpu.memory_space<vmem>>, vector<16x768xbf16>
    %c0_1 = arith.constant 0 : index
    %c0_2 = arith.constant 0 : index
    %1 = vector.load %arg2[%c0_1, %c0_2] : memref<768x256xbf16, #tpu.memory_space<vmem>>, vector<768x256xbf16>
    %cst = arith.constant dense<0.000000e+00> : vector<16x256xf32>
    %2 = tpu.matmul %0, %1, %cst {dimension_numbers = #tpu.dot_dimension_numbers<[1], [0], [0], [1], [0, 0, 1, 1], [], []>} : vector<16x768xbf16>, vector<768x256xbf16>, vector<16x256xf32> -> vector<16x256xf32>
    %c0_3 = arith.constant 0 : index
    %c0_4 = arith.constant 0 : index
    %3 = vector.load %arg3[%c0_3, %c0_4] : memref<1x256xf32, #tpu.memory_space<vmem>>, vector<1x256xf32>
    %4 = vector.broadcast %3 : vector<1x256xf32> to vector<16x256xf32>
    %5 = arith.addf %2, %4 : vector<16x256xf32>
    %cst_5 = arith.constant 5.000000e-01 : f32
    %6 = vector.broadcast %cst_5 : f32 to vector<16x256xf32>
    %7 = arith.mulf %6, %5 : vector<16x256xf32>
    %cst_6 = arith.constant 0.707106769 : f32
    %8 = vector.broadcast %cst_6 : f32 to vector<16x256xf32>
    %9 = arith.mulf %5, %8 : vector<16x256xf32>
    %10 = math.erf %9 : vector<16x256xf32>
    %cst_7 = arith.constant 1.000000e+00 : f32
    %11 = vector.broadcast %cst_7 : f32 to vector<16x256xf32>
    %12 = arith.addf %11, %10 : vector<16x256xf32>
    %13 = arith.mulf %7, %12 : vector<16x256xf32>
    %14 = arith.truncf %13 : vector<16x256xf32> to vector<16x256xbf16>
    %c0_8 = arith.constant 0 : index
    %c0_9 = arith.constant 0 : index
    %15 = vector.load %arg4[%c0_8, %c0_9] : memref<256x128xbf16, #tpu.memory_space<vmem>>, vector<256x128xbf16>
    %cst_10 = arith.constant dense<0.000000e+00> : vector<16x128xf32>
    %16 = tpu.matmul %14, %15, %cst_10 {dimension_numbers = #tpu.dot_dimension_numbers<[1], [0], [0], [1], [0, 0, 1, 1], [], []>} : vector<16x256xbf16>, vector<256x128xbf16>, vector<16x128xf32> -> vector<16x128xf32>
    %c0_11 = arith.constant 0 : index
    %c0_12 = arith.constant 0 : index
    %17 = vector.load %arg5[%c0_11, %c0_12] : memref<1x128xf32, #tpu.memory_space<vmem>>, vector<1x128xf32>
    %18 = vector.broadcast %17 : vector<1x128xf32> to vector<16x128xf32>
    %19 = arith.addf %16, %18 : vector<16x128xf32>
    %cst_13 = arith.constant 5.000000e-01 : f32
    %20 = vector.broadcast %cst_13 : f32 to vector<16x128xf32>
    %21 = arith.mulf %20, %19 : vector<16x128xf32>
    %cst_14 = arith.constant 0.707106769 : f32
    %22 = vector.broadcast %cst_14 : f32 to vector<16x128xf32>
    %23 = arith.mulf %19, %22 : vector<16x128xf32>
    %24 = math.erf %23 : vector<16x128xf32>
    %cst_15 = arith.constant 1.000000e+00 : f32
    %25 = vector.broadcast %cst_15 : f32 to vector<16x128xf32>
    %26 = arith.addf %25, %24 : vector<16x128xf32>
    %27 = arith.mulf %21, %26 : vector<16x128xf32>
    %28 = arith.truncf %27 : vector<16x128xf32> to vector<16x128xbf16>
    %c0_16 = arith.constant 0 : index
    %c0_17 = arith.constant 0 : index
    %29 = vector.load %arg6[%c0_16, %c0_17] : memref<128x10xbf16, #tpu.memory_space<vmem>>, vector<128x10xbf16>
    %cst_18 = arith.constant dense<0.000000e+00> : vector<16x10xf32>
    %30 = tpu.matmul %28, %29, %cst_18 {dimension_numbers = #tpu.dot_dimension_numbers<[1], [0], [0], [1], [0, 0, 1, 1], [], []>} : vector<16x128xbf16>, vector<128x10xbf16>, vector<16x10xf32> -> vector<16x10xf32>
    %c0_19 = arith.constant 0 : index
    %c0_20 = arith.constant 0 : index
    %31 = vector.load %arg7[%c0_19, %c0_20] : memref<1x10xf32, #tpu.memory_space<vmem>>, vector<1x10xf32>
    %32 = vector.broadcast %31 : vector<1x10xf32> to vector<16x10xf32>
    %33 = arith.addf %30, %32 : vector<16x10xf32>
    %c0_21 = arith.constant 0 : index
    %c0_22 = arith.constant 0 : index
    %34 = vector.load %arg8[%c0_21, %c0_22] : memref<16x10xf32, #tpu.memory_space<vmem>>, vector<16x10xf32>
    tpu.vector_store %arg8[%c0_21, %c0_22], %33 {strides = array<i32>} : memref<16x10xf32, #tpu.memory_space<vmem>>, vector<16x10xf32>,
    return
  }
  func.func @transform_0(%arg0: i32) -> (i32, i32) {
    %c0_i32 = arith.constant 0 : i32
    %c0_i32_0 = arith.constant 0 : i32
    return %arg0, %c0_i32 : i32, i32
  }
  func.func @transform_1(%arg0: i32) -> (i32, i32) {
    %c0_i32 = arith.constant 0 : i32
    %c0_i32_0 = arith.constant 0 : i32
    %c0_i32_1 = arith.constant 0 : i32
    return %c0_i32, %c0_i32_0 : i32, i32
  }
  func.func @transform_2(%arg0: i32) -> (i32, i32) {
    %c0_i32 = arith.constant 0 : i32
    %c0_i32_0 = arith.constant 0 : i32
    %c0_i32_1 = arith.constant 0 : i32
    return %c0_i32, %c0_i32_0 : i32, i32
  }
  func.func @transform_3(%arg0: i32) -> (i32, i32) {
    %c0_i32 = arith.constant 0 : i32
    %c0_i32_0 = arith.constant 0 : i32
    %c0_i32_1 = arith.constant 0 : i32
    return %c0_i32, %c0_i32_0 : i32, i32
  }
  func.func @transform_4(%arg0: i32) -> (i32, i32) {
    %c0_i32 = arith.constant 0 : i32
    %c0_i32_0 = arith.constant 0 : i32
    %c0_i32_1 = arith.constant 0 : i32
    return %c0_i32, %c0_i32_0 : i32, i32
  }
  func.func @transform_5(%arg0: i32) -> (i32, i32) {
    %c0_i32 = arith.constant 0 : i32
    %c0_i32_0 = arith.constant 0 : i32
    %c0_i32_1 = arith.constant 0 : i32
    return %c0_i32, %c0_i32_0 : i32, i32
  }
  func.func @transform_6(%arg0: i32) -> (i32, i32) {
    %c0_i32 = arith.constant 0 : i32
    %c0_i32_0 = arith.constant 0 : i32
    %c0_i32_1 = arith.constant 0 : i32
    return %c0_i32, %c0_i32_0 : i32, i32
  }
  func.func @transform_7(%arg0: i32) -> (i32, i32) {
    %c0_i32 = arith.constant 0 : i32
    %c0_i32_0 = arith.constant 0 : i32
    return %arg0, %c0_i32 : i32, i32
  }
}

</mosaic_0001>

<bundles_post_ra>
// kernel: tpu_custom_call.1
= control target key start
LH: loop header
LB: loop body
LE: loop exit
PB: predicated region body
PF: predicated region fallthrough
CT: control target
= control target key end

     0   :  { %12 = vsyncpa [#allocation3], 0  ;;  %s2302_s0 = inlined_call_operand.hbm [shape: bf16[32,768], index: 0, kind: input, shape index: {}]   ;;  %s2303_s1 = inlined_call_operand.hbm [shape: bf16[768,256], index: 1, kind: input, shape index: {}]   ;;  %s2304_s2 = inlined_call_operand.vmem [shape: f32[1,256], index: 2, kind: input, shape index: {}]   ;;  %s2305_s3 = inlined_call_operand.hbm [shape: bf16[256,128], index: 3, kind: input, shape index: {}]   ;;  %s2306_s4 = inlined_call_operand.vmem [shape: f32[1,128], index: 4, kind: input, shape index: {}]   ;;  %s2307_s5 = inlined_call_operand.vmem [shape: bf16[128,10], index: 5, kind: input, shape index: {}]   ;;  %s2308_s6 = inlined_call_operand.vmem [shape: f32[1,10], index: 6, kind: input, shape index: {}]   ;;  %s2309_s7 = inlined_call_operand.vmem [shape: f32[32,10], index: 7, kind: output, shape index: {}]  }
   0x1   :  { %14 = vsyncpa [#allocation3 + $0x1], 0 }
   0x2   :  { %15 = vsyncpa [#allocation5], 0  ;;  %s2121_s24 = smov 0   ;;  %s2123_s25 = smov 0  }
   0x3   :  { %s2125_s26 = smov 0   ;;  %s2127_s27 = smov 0  }
   0x4 LB: > { %s1495_s28 = sadd.s32 4294967295, %s2068_s27   ;;  %p41_p0 = scmp.ne.s32.totalorder %s2060_s25, %s2056_s24  ;;  %s2068_s27 = sphi %s2127_s27, %s2322_s27   ;;  %s2064_s26 = sphi %s2125_s26, %s2325_s26   ;;  %s2060_s25 = sphi %s2123_s25, %s2324_s25   ;;  %s2056_s24 = sphi %s2121_s24, %s2323_s24  }
   0x5   : > { %p2143_p1 = scmp.eq.s32.totalorder %s1495_s28, 0  ;;  %p1497_p2 = scmp.ge.s32.totalorder %s2068_s27, 1 }
   0x6   : > { %p204_p3 = scmp.lt.s32.totalorder %s2068_s27, 3  ;;  %s2070_s9 = smov [#allocation4]  }
   0x7   : > { %s2314_s29 = scalar_select %p2143_p1, 1, 0 }
   0x8   : > { %p2151_p4 = por %p2143_p1, %p41_p0  ;;  %p2155_p5 = pnand %p1497_p2, %p204_p3 }
   0x9   : > { %s216_s10 = sshll.u32 %s2070_s9, 4  ;;  %s2071_s12 = smov [#allocation6]   ;;  %s217_s10 = int_to_ptr.vmem [resolvable:$true] %s216_s10 }
   0xa   : > { %s2315_s30 = scalar_select %p2151_p4, 1, 0 }
   0xb   : > { %s2316_s8 = scalar_select %p2155_p5, 1, 0 }
   0xc   : > { %p1703_p6 = pneg %p2155_p5  ;;  %s232_s13 = sshll.u32 %s2071_s12, 4  ;;  %s233_s13 = int_to_ptr.vmem [resolvable:$true] %s232_s13 }
   0xd   : > { %s1961_s14 = scalar_lea.vmem %s217_s10, 12288  ;;  %p1969_p12 = scmp.lt.s32.totalorder %s217_s10, %s217_s10 }
   0xe   : > { %p2163_p7 = pnand %p1703_p6, %p2143_p1  ;;  %p1962_p9 = scmp.ne.s32.totalorder %s217_s10, %s1961_s14 }
   0xf   : > { %p1970_p13 = scmp.lt.s32.totalorder %s1961_s14, %s1961_s14 }
  0x10   : > { %p1952_p8 = pneg %p2163_p7 }
  0x11   : > { %p1971_p0 = por %p1970_p13, %p1969_p12 }
  0x12   : > { %p1964_p10 = pnand %p1962_p9, %p1952_p8 }
  0x14   : > { %p1965_p11 = pneg %p1964_p10 }
  0x16   : > { %p1972_p2 = pnand %p1971_p0, %p1965_p11 }
  0x18   : > { %1975 = shalt.err (!%p1972_p2)
}
  0x19   : > { %s2072_s15 = smov 128   ;;  %s2073_s16 = smov 8  }
  0x1a   : > { %1706 = dma.hbm_to_vmem [thread:$0]  (!%p2163_p7), %s2303_s1, 12288, %s217_s10, [#allocation5], %s2072_s15, %s2072_s15, %s2073_s16  }
  0x1b   : > { %s1987_s19 = scalar_lea.vmem %s233_s13, 2048  ;;  %p1995_p10 = scmp.lt.s32.totalorder %s233_s13, %s233_s13 }
  0x1c   : > { %p1988_p3 = scmp.ne.s32.totalorder %s233_s13, %s1987_s19  ;;  %p1996_p1 = scmp.lt.s32.totalorder %s1987_s19, %s1987_s19 }
  0x1e   : > { %p1990_p6 = pnand %p1988_p3, %p1952_p8  ;;  %p1997_p12 = por %p1996_p1, %p1995_p10 }
  0x20   : > { %p1991_p9 = pneg %p1990_p6 }
  0x22   : > { %p1998_p11 = pnand %p1997_p12, %p1991_p9 }
  0x24   : > { %2001 = shalt.err (!%p1998_p11)
}
  0x25   : > { %s2074_s20 = smov 64   ;;  %s2075_s21 = smov 4  }
  0x26   : > { %1709 = dma.hbm_to_vmem [thread:$0]  (!%p2163_p7), %s2305_s3, 2048, %s233_s13, [#allocation5], %s2074_s20, %s2074_s20, %s2075_s21  }
  0x27   : > { %s2186_s24 = sadd.s32 1, %s2068_s27   ;;  %s28_s10 = sadd.s32 1, %s2064_s26 }
  0x28   : > { %s25_s9 = ssub.s32 %s2068_s27, %s2186_s24  ;;  %p35_p8 = scmp.ne.s32.totalorder %s2064_s26, %s2060_s25 }
  0x29   : > { %p26_p1 = scmp.eq.s32.totalorder %s25_s9, 0  ;;  %p36_p13 = scmp.eq.s32.totalorder %s2068_s27, 0 }
  0x2a   : > { %p1716_p2 = scmp.lt.s32.totalorder %s2068_s27, 2  ;;  %s255_s14 = sand.u32 1, %s2064_s26  }
  0x2b   : > { %s2195_s12 = scalar_select %p26_p1, %s2064_s26, %s28_s10  }
  0x2c   : > { %p37_p0 = por %p36_p13, %p35_p8  ;;  %s1691_s15 = smul.u32 768, %s2068_s27 }
  0x2d   : > { %s1690_s16 = smul.u32 48, %s255_s14  ;;  %s2211_s21 = scalar_lea.sflag [#allocation3], %s255_s14 }
  0x2e   : > { %s2203_s18 = scalar_lea.hbm %s2302_s0, %s1691_s15  ;;  %p2205_p7 = pnand %p1716_p2, %p37_p0 }
  0x2f   : > { %s259_s19 = scalar_lea.vmem [#allocation2], %s1690_s16  ;;  %s2002_s22 = scalar_lea.hbm %s2203_s18, 768 }
  0x30   : > { %s267_s20 = sshll.u32 %s259_s19, 4  ;;  %p2003_p3 = scmp.ne.s32.totalorder %s2203_s18, %s2002_s22  ;;  %s2209_s20 = int_to_ptr.vmem [resolvable:$true] %s267_s20 }
  0x31   : > { %p2004_p6 = pneg %p2205_p7  ;;  %s2007_s10 = scalar_lea.hbm %s2302_s0, 1536 }
  0x32   : > { %p2008_p12 = scmp.lt.s32.totalorder %s2203_s18, %s2302_s0  ;;  %p2009_p11 = scmp.lt.s32.totalorder %s2007_s10, %s2002_s22 }
  0x33   : > { %p2005_p9 = pnand %p2004_p6, %p2003_p3 }
  0x34   : > { %p2010_p1 = por %p2009_p11, %p2008_p12 }
  0x35   : > { %p2006_p10 = pneg %p2005_p9 }
  0x37   : > { %p2011_p8 = pnand %p2010_p1, %p2006_p10 }
  0x39   : > { %2014 = shalt.err (!%p2011_p8)
}
  0x3a   : > { %s2015_s14 = scalar_lea.vmem %s2209_s20, 768  ;;  %s2076_s16 = smov [#allocation2]  }
  0x3b   : > { %p2016_p13 = scmp.ne.s32.totalorder %s2209_s20, %s2015_s14  ;;  %s2020_s17 = sshll.u32 %s2076_s16, 4  ;;  %s2021_s17 = int_to_ptr.vmem [resolvable:$false] %s2020_s17 }
  0x3c   : > { %s2022_s19 = scalar_lea.vmem %s2021_s17, 1536  ;;  %p2023_p3 = scmp.lt.s32.totalorder %s2209_s20, %s2021_s17 }
  0x3d   : > { %p2018_p0 = pnand %p2016_p13, %p2004_p6  ;;  %p2024_p9 = scmp.lt.s32.totalorder %s2022_s19, %s2015_s14 }
  0x3f   : > { %p2019_p2 = pneg %p2018_p0  ;;  %p2025_p4 = por %p2024_p9, %p2023_p3 }
  0x41   : > { %p2026_p5 = pnand %p2025_p4, %p2019_p2 }
  0x43   : > { %2029 = shalt.err (!%p2026_p5)
}
  0x44   : > { %s2077_s22 = smov 384   ;;  %s2078_s23 = smov 24  }
  0x45   : > { %1713 = dma.hbm_to_vmem [thread:$0]  (!%p2205_p7), %s2203_s18, 768, %s2209_s20, %s2211_s21, %s2077_s22, %s2077_s22, %s2078_s23  }
  0x46   : > { %p2319_p6 = scmp.ne.s32.totalorder %s2316_s8, 0 }
  0x47   : > { %s281_s9 = sand.u32 (!%p2319_p6), 1, %s2060_s25   ;;  %p2320_p4 = scmp.ne.s32.totalorder (!%p2319_p6), %s2315_s30, 0 }
  0x48   : > { %279 = sbr.rel (%p2319_p6) target bundleno = 859 (0x35b), region = 48  ;;  %s282_s15 = scalar_lea.sflag (!%p2319_p6), [#allocation3], %s281_s9 }
  0x49   : > { %s1692_s10 = smul.u32 (!%p2319_p6), 48, %s281_s9 }
  0x4b   : > { %s2235_s11 = scalar_lea.vmem (!%p2319_p6), [#allocation2], %s1692_s10 }
  0x4d   : > { %2047 = dma.done.wait (%p2320_p4), %s282_s15, 768  }
  0x4e   : > { %2049 = vsyncadd (%p2320_p4), %s282_s15, 4294966528  ;;  %p2321_p5 = scmp.ne.s32.totalorder %s2314_s29, 0 }
  0x50   : > { %2051 = dma.done.wait (%p2321_p5), [#allocation5], 14336  }
  0x51   : > { %2053 = vsyncadd (%p2321_p5), [#allocation5], 4294952960  ;;  %v1761_v0 = vld [vmem:[#allocation4 + $0x74] ss:$8 sps:$4 sm:$0xff]   ;;  %v1763_v1 = vld [vmem:[#allocation4 + $0x70] ss:$8 sps:$4 sm:$0xff]  }
  0x52   : > { %956 = vmatprep.subr.bf16.mxu0 %v1761_v0  ;;  %v1764_v2 = vld [vmem:[#allocation4 + $0x174] ss:$8 sps:$4 sm:$0xff]   ;;  %v1766_v3 = vld [vmem:[#allocation4 + $0x170] ss:$8 sps:$4 sm:$0xff]   ;;  %v1767_v4 = vld [vmem:[#allocation4 + $0x64] ss:$8 sps:$4 sm:$0xff]  }
  0x53   : > { %957 = vmatpush1.bf16.msra.mxu0 %v1763_v1  ;;  %v1769_v5 = vld [vmem:[#allocation4 + $0x60] ss:$8 sps:$4 sm:$0xff]   ;;  %999 = vmatprep.subr.bf16.mxu1 %v1764_v2  ;;  %v1770_v6 = vld [vmem:[#allocation4 + $0x164] ss:$8 sps:$4 sm:$0xff]   ;;  %v1773_v8 = vld [vmem:[#allocation4 + $0x54] ss:$8 sps:$4 sm:$0xff]  }
  0x54   : > { %1000 = vmatpush1.bf16.msra.mxu1 %v1766_v3  ;;  %958 = vmatprep.subr.bf16.mxu0 %v1767_v4  ;;  %v1772_v7 = vld [vmem:[#allocation4 + $0x160] ss:$8 sps:$4 sm:$0xff]   ;;  %v1775_v9 = vld [vmem:[#allocation4 + $0x50] ss:$8 sps:$4 sm:$0xff]   ;;  %v1776_v10 = vld [vmem:[#allocation4 + $0x154] ss:$8 sps:$4 sm:$0xff]  }
  0x55   : > { %1001 = vmatprep.subr.bf16.mxu1 %v1770_v6  ;;  %v1779_v11 = vld [vmem:[#allocation4 + $0x44] ss:$8 sps:$4 sm:$0xff]   ;;  %v1778_v12 = vld [vmem:[#allocation4 + $0x150] ss:$8 sps:$4 sm:$0xff]   ;;  %v1781_v14 = vld [vmem:[#allocation4 + $0x40] ss:$8 sps:$4 sm:$0xff]  }
  0x56   : > { %v1782_v13 = vld [vmem:[#allocation4 + $0x144] ss:$8 sps:$4 sm:$0xff]   ;;  %v1785_v15 = vld [vmem:[#allocation4 + $0x34] ss:$8 sps:$4 sm:$0xff]   ;;  %v1784_v16 = vld [vmem:[#allocation4 + $0x140] ss:$8 sps:$4 sm:$0xff]  }
  0x57   : > { %959 = vmatpush1.bf16.msra.mxu0 %v1769_v5  ;;  %v1788_v17 = vld [vmem:[#allocation4 + $0x134] ss:$8 sps:$4 sm:$0xff]   ;;  %v1787_v18 = vld [vmem:[#allocation4 + $0x30] ss:$8 sps:$4 sm:$0xff]   ;;  %v1791_v19 = vld [vmem:[#allocation4 + $0x24] ss:$8 sps:$4 sm:$0xff]  }
  0x58   : > { %960 = vmatprep.subr.bf16.mxu0 %v1773_v8  ;;  %1002 = vmatpush1.bf16.msra.mxu1 %v1772_v7  ;;  %v1790_v20 = vld [vmem:[#allocation4 + $0x130] ss:$8 sps:$4 sm:$0xff]   ;;  %v1794_v21 = vld [vmem:[#allocation4 + $0x124] ss:$8 sps:$4 sm:$0xff]   ;;  %v1793_v22 = vld [vmem:[#allocation4 + $0x20] ss:$8 sps:$4 sm:$0xff]  }
  0x59   : > { %1003 = vmatprep.subr.bf16.mxu1 %v1776_v10  ;;  %v1797_v23 = vld [vmem:[#allocation4 + $0x14] ss:$8 sps:$4 sm:$0xff]   ;;  %v1796_v24 = vld [vmem:[#allocation4 + $0x120] ss:$8 sps:$4 sm:$0xff]   ;;  %v1799_v26 = vld [vmem:[#allocation4 + $0x10] ss:$8 sps:$4 sm:$0xff]  }
  0x5a   : > { %v1800_v25 = vld [vmem:[#allocation4 + $0x114] ss:$8 sps:$4 sm:$0xff]   ;;  %v1803_v27 = vld [vmem:[#allocation4 + $0x4] ss:$8 sps:$4 sm:$0xff]   ;;  %v1802_v28 = vld [vmem:[#allocation4 + $0x110] ss:$8 sps:$4 sm:$0xff]  }
  0x5b   : > { %961 = vmatpush1.bf16.msra.mxu0 %v1775_v9  ;;  %v1806_v29 = vld [vmem:[#allocation4 + $0x104] ss:$8 sps:$4 sm:$0xff]   ;;  %v1805_v30 = vld [vmem:[#allocation4] ss:$8 sps:$4 sm:$0xff]   ;;  %v1809_v31 = vld [vmem:[#allocation4 + $0xf4] ss:$8 sps:$4 sm:$0xff]  }
  0x5c   : > { %962 = vmatprep.subr.bf16.mxu0 %v1779_v11  ;;  %1004 = vmatpush1.bf16.msra.mxu1 %v1778_v12  ;;  %v1808_v32 = vld [vmem:[#allocation4 + $0x100] ss:$8 sps:$4 sm:$0xff]   ;;  %v1812_v33 = vld [vmem:[#allocation4 + $0x1f4] ss:$8 sps:$4 sm:$0xff]   ;;  %v1811_v34 = vld [vmem:[#allocation4 + $0xf0] ss:$8 sps:$4 sm:$0xff]  }
  0x5d   : > { %1005 = vmatprep.subr.bf16.mxu1 %v1782_v13  ;;  %v1815_v35 = vld [vmem:[#allocation4 + $0xe4] ss:$8 sps:$4 sm:$0xff]   ;;  %v1814_v36 = vld [vmem:[#allocation4 + $0x1f0] ss:$8 sps:$4 sm:$0xff]   ;;  %v1817_v38 = vld [vmem:[#allocation4 + $0xe0] ss:$8 sps:$4 sm:$0xff]  }
  0x5e   : > { %v1818_v37 = vld [vmem:[#allocation4 + $0x1e4] ss:$8 sps:$4 sm:$0xff]   ;;  %v1821_v39 = vld [vmem:[#allocation4 + $0xd4] ss:$8 sps:$4 sm:$0xff]   ;;  %v1820_v40 = vld [vmem:[#allocation4 + $0x1e0] ss:$8 sps:$4 sm:$0xff]  }
  0x5f   : > { %963 = vmatpush1.bf16.msra.mxu0 %v1781_v14  ;;  %v1824_v41 = vld [vmem:[#allocation4 + $0x1d4] ss:$8 sps:$4 sm:$0xff]   ;;  %v1823_v42 = vld [vmem:[#allocation4 + $0xd0] ss:$8 sps:$4 sm:$0xff]   ;;  %v1827_v43 = vld [vmem:[#allocation4 + $0xc4] ss:$8 sps:$4 sm:$0xff]  }
  0x60   : > { %964 = vmatprep.subr.bf16.mxu0 %v1785_v15  ;;  %1006 = vmatpush1.bf16.msra.mxu1 %v1784_v16  ;;  %v1826_v44 = vld [vmem:[#allocation4 + $0x1d0] ss:$8 sps:$4 sm:$0xff]   ;;  %v1830_v45 = vld [vmem:[#allocation4 + $0x1c4] ss:$8 sps:$4 sm:$0xff]   ;;  %v1829_v46 = vld [vmem:[#allocation4 + $0xc0] ss:$8 sps:$4 sm:$0xff]  }
  0x61   : > { %1007 = vmatprep.subr.bf16.mxu1 %v1788_v17  ;;  %v1858_v47 = vld [vmem:[%s2235_s11 + $0x4] ss:$24 sps:$4 sm:$0xff]   ;;  %v1832_v49 = vld [vmem:[#allocation4 + $0x1c0] ss:$8 sps:$4 sm:$0xff]   ;;  %v1835_v52 = vld [vmem:[#allocation4 + $0xb0] ss:$8 sps:$4 sm:$0xff]  }
  0x62   : > { %v1833_v48 = vld [vmem:[#allocation4 + $0xb4] ss:$8 sps:$4 sm:$0xff]   ;;  %988 = vmatprep.mubr.bf16.mxu0 %v1858_v47  ;;  %v1839_v53 = vld [vmem:[#allocation4 + $0xa4] ss:$8 sps:$4 sm:$0xff]   ;;  %v1838_v54 = vld [vmem:[#allocation4 + $0x1b0] ss:$8 sps:$4 sm:$0xff]  }
  0x63   : > { %965 = vmatpush1.bf16.msra.mxu0 %v1787_v18  ;;  %v1836_v50 = vld [vmem:[#allocation4 + $0x1b4] ss:$8 sps:$4 sm:$0xff]   ;;  %v1842_v55 = vld [vmem:[#allocation4 + $0x1a4] ss:$8 sps:$4 sm:$0xff]   ;;  %v1841_v56 = vld [vmem:[#allocation4 + $0xa0] ss:$8 sps:$4 sm:$0xff]  }
  0x64   : > { %966 = vmatprep.subr.bf16.mxu0 %v1791_v19  ;;  %1008 = vmatpush1.bf16.msra.mxu1 %v1790_v20  ;;  %v1865_v51 = vld [vmem:[%s2235_s11 + $0xc] ss:$24 sps:$4 sm:$0xff]   ;;  %v1844_v58 = vld [vmem:[#allocation4 + $0x1a0] ss:$8 sps:$4 sm:$0xff]   ;;  %v1847_v60 = vld [vmem:[#allocation4 + $0x90] ss:$8 sps:$4 sm:$0xff]  }
  0x65   : > { %1009 = vmatprep.subr.bf16.mxu1 %v1794_v21  ;;  %1031 = vmatprep.mubr.bf16.mxu1 %v1865_v51  ;;  %v1845_v57 = vld [vmem:[#allocation4 + $0x94] ss:$8 sps:$4 sm:$0xff]   ;;  %v1851_v61 = vld [vmem:[#allocation4 + $0x84] ss:$8 sps:$4 sm:$0xff]   ;;  %v1850_v62 = vld [vmem:[#allocation4 + $0x190] ss:$8 sps:$4 sm:$0xff]  }
  0x66   : > { %v1848_v59 = vld [vmem:[#allocation4 + $0x194] ss:$8 sps:$4 sm:$0xff]   ;;  %v1854_v63 = vld [vmem:[#allocation4 + $0x184] ss:$8 sps:$4 sm:$0xff]   ;;  %v1853_v0 = vld [vmem:[#allocation4 + $0x80] ss:$8 sps:$4 sm:$0xff]  }
  0x67   : > { %967 = vmatpush1.bf16.msra.mxu0 %v1793_v22  ;;  %v1862_v1 = vld [vmem:[#allocation4 + $0x274] ss:$8 sps:$4 sm:$0xff]   ;;  %v1859_v2 = vld [vmem:[#allocation4 + $0x180] ss:$8 sps:$4 sm:$0xff]   ;;  %v1860_v4 = vld [vmem:[#allocation4 + $0x270] ss:$8 sps:$4 sm:$0xff]  }
  0x68   : > { %968 = vmatprep.subr.bf16.mxu0 %v1797_v23  ;;  %1010 = vmatpush1.bf16.msra.mxu1 %v1796_v24  ;;  %v1856_v3 = vld [vmem:[%s2235_s11] ss:$24 sps:$4 sm:$0xff]   ;;  %v1868_v6 = vld [vmem:[#allocation4 + $0x264] ss:$8 sps:$4 sm:$0xff]   ;;  %v1871_v9 = vld [vmem:[#allocation4 + $0x254] ss:$8 sps:$4 sm:$0xff]  }
  0x69   : > { %1011 = vmatprep.subr.bf16.mxu1 %v1800_v25  ;;  %v1863_v5 = vld [vmem:[%s2235_s11 + $0x8] ss:$24 sps:$4 sm:$0xff]   ;;  %v1913_v8 = vld [vmem:[%s2235_s11 + $0x14] ss:$24 sps:$4 sm:$0xff]   ;;  %vm2080_vm0 = vmmov 0   ;;  %s1507_s18 = sshll.u32 %s1495_s28, 1 }
  0x6a   : > { %v1866_v7 = vld [vmem:[#allocation4 + $0x260] ss:$8 sps:$4 sm:$0xff]   ;;  %v1869_v10 = vld [vmem:[#allocation4 + $0x250] ss:$8 sps:$4 sm:$0xff]   ;;  %v1874_v11 = vld [vmem:[#allocation4 + $0x244] ss:$8 sps:$4 sm:$0xff]  }
  0x6b   : > { %969 = vmatpush1.bf16.msra.mxu0 %v1799_v26  ;;  %v1872_v12 = vld [vmem:[#allocation4 + $0x240] ss:$8 sps:$4 sm:$0xff]   ;;  %v1877_v13 = vld [vmem:[#allocation4 + $0x234] ss:$8 sps:$4 sm:$0xff]   ;;  %v1875_v14 = vld [vmem:[#allocation4 + $0x230] ss:$8 sps:$4 sm:$0xff]  }
  0x6c   : > { %970 = vmatprep.subr.bf16.mxu0 %v1803_v27  ;;  %1012 = vmatpush1.bf16.msra.mxu1 %v1802_v28  ;;  %v1880_v15 = vld [vmem:[#allocation4 + $0x224] ss:$8 sps:$4 sm:$0xff]   ;;  %v1878_v16 = vld [vmem:[#allocation4 + $0x220] ss:$8 sps:$4 sm:$0xff]   ;;  %v1883_v17 = vld [vmem:[#allocation4 + $0x214] ss:$8 sps:$4 sm:$0xff]  }
  0x6d   : > { %1013 = vmatprep.subr.bf16.mxu1 %v1806_v29  ;;  %v1881_v18 = vld [vmem:[#allocation4 + $0x210] ss:$8 sps:$4 sm:$0xff]   ;;  %v1886_v19 = vld [vmem:[#allocation4 + $0x204] ss:$8 sps:$4 sm:$0xff]   ;;  %v1884_v20 = vld [vmem:[#allocation4 + $0x200] ss:$8 sps:$4 sm:$0xff]  }
  0x6e   : > { %v1889_v21 = vld [vmem:[#allocation4 + $0x2f4] ss:$8 sps:$4 sm:$0xff]   ;;  %v1887_v22 = vld [vmem:[#allocation4 + $0x2f0] ss:$8 sps:$4 sm:$0xff]   ;;  %v1892_v23 = vld [vmem:[#allocation4 + $0x2e4] ss:$8 sps:$4 sm:$0xff]  }
  0x6f   : > { %971 = vmatpush1.bf16.msra.mxu0 %v1805_v30  ;;  %v1890_v24 = vld [vmem:[#allocation4 + $0x2e0] ss:$8 sps:$4 sm:$0xff]   ;;  %v1895_v25 = vld [vmem:[#allocation4 + $0x2d4] ss:$8 sps:$4 sm:$0xff]   ;;  %v1893_v26 = vld [vmem:[#allocation4 + $0x2d0] ss:$8 sps:$4 sm:$0xff]  }
  0x70   : > { %972 = vmatprep.subr.bf16.mxu0 %v1809_v31  ;;  %1014 = vmatpush1.bf16.msra.mxu1 %v1808_v32  ;;  %v1898_v27 = vld [vmem:[#allocation4 + $0x2c4] ss:$8 sps:$4 sm:$0xff]   ;;  %v1896_v28 = vld [vmem:[#allocation4 + $0x2c0] ss:$8 sps:$4 sm:$0xff]   ;;  %v1901_v29 = vld [vmem:[#allocation4 + $0x2b4] ss:$8 sps:$4 sm:$0xff]  }
  0x71   : > { %1015 = vmatprep.subr.bf16.mxu1 %v1812_v33  ;;  %v1899_v30 = vld [vmem:[#allocation4 + $0x2b0] ss:$8 sps:$4 sm:$0xff]   ;;  %v1904_v31 = vld [vmem:[#allocation4 + $0x2a4] ss:$8 sps:$4 sm:$0xff]   ;;  %v1902_v32 = vld [vmem:[#allocation4 + $0x2a0] ss:$8 sps:$4 sm:$0xff]  }
  0x72   : > { %v1907_v33 = vld [vmem:[#allocation4 + $0x294] ss:$8 sps:$4 sm:$0xff]   ;;  %v1927_v51 = vld [vmem:[#allocation6 + $0x8] sm:$0xff]   ;;  %p326_p7 = scmp.lt.s32.totalorder %s1507_s18, 3  ;;  %vm1406_vm1 = vcmask 80896  }
  0x73   : > { %973 = vmatpush2.bf16.msra.mxu0 %v1811_v34  ;;  %v1905_v34 = vld [vmem:[#allocation4 + $0x290] ss:$8 sps:$4 sm:$0xff]  }
  0x74   : > { %974 = vmatprep.subr.bf16.mxu0 %v1815_v35  ;;  %1016 = vmatpush2.bf16.msra.mxu1 %v1814_v36  ;;  %v1910_v35 = vld [vmem:[#allocation4 + $0x284] ss:$8 sps:$4 sm:$0xff]   ;;  %v1908_v36 = vld [vmem:[#allocation4 + $0x280] ss:$8 sps:$4 sm:$0xff]   ;;  %v1923_v47 = vld [vmem:[#allocation6 + $0x18] sm:$0xff]   ;;  %s2327_s18 = smov (!%p326_p7, %s1507_s18), 3 }
  0x75   : > { %1017 = vmatprep.subr.bf16.mxu1 %v1818_v37  ;;  %v1911_v37 = vld [vmem:[%s2235_s11 + $0x10] ss:$24 sps:$4 sm:$0xff]   ;;  %s1508_s13 = sshll.u32 %s2327_s18, 3 }
  0x76   : > { %s329_s17 = scalar_lea.vmem %s2309_s7, %s1508_s13 }
  0x77   : > { %975 = vmatpush2.bf16.msra.mxu0 %v1817_v38  ;;  %v1914_v38 = vld [vmem:[#allocation6 + $0x78] sm:$0xff]  }
  0x78   : > { %976 = vmatprep.subr.bf16.mxu0 %v1821_v39  ;;  %1018 = vmatpush2.bf16.msra.mxu1 %v1820_v40  ;;  %v1915_v39 = vld [vmem:[#allocation6 + $0x38] sm:$0xff]   ;;  %v1916_v40 = vld [vmem:[#allocation6 + $0x70] sm:$0xff]  }
  0x79   : > { %1019 = vmatprep.subr.bf16.mxu1 %v1824_v41  ;;  %v1917_v41 = vld [vmem:[#allocation6 + $0x30] sm:$0xff]  }
  0x7b   : > { %977 = vmatpush2.bf16.msra.mxu0 %v1823_v42  ;;  %v1918_v42 = vld [vmem:[#allocation6 + $0x68] sm:$0xff]  }
  0x7c   : > { %978 = vmatprep.subr.bf16.mxu0 %v1827_v43  ;;  %1020 = vmatpush2.bf16.msra.mxu1 %v1826_v44  ;;  %v1919_v43 = vld [vmem:[#allocation6 + $0x28] sm:$0xff]   ;;  %v1920_v44 = vld [vmem:[#allocation6 + $0x60] sm:$0xff]  }
  0x7d   : > { %1021 = vmatprep.subr.bf16.mxu1 %v1830_v45  ;;  %v1921_v45 = vld [vmem:[#allocation6 + $0x20] sm:$0xff]  }
  0x7f   : > { %979 = vmatpush2.bf16.msra.mxu0 %v1829_v46  ;;  %v1922_v46 = vld [vmem:[#allocation6 + $0x58] sm:$0xff]  }
  0x80   : > { %980 = vmatprep.subr.bf16.mxu0 %v1833_v48  ;;  %1022 = vmatpush2.bf16.msra.mxu1 %v1832_v49  ;;  %v1924_v48 = vld [vmem:[#allocation6 + $0x50] sm:$0xff]  }
  0x81   : > { %1023 = vmatprep.subr.bf16.mxu1 %v1836_v50  ;;  %v1925_v49 = vld [vmem:[#allocation6 + $0x10] sm:$0xff]   ;;  %v1926_v50 = vld [vmem:[#allocation6 + $0x48] sm:$0xff]  }
  0x83   : > { %981 = vmatpush2.bf16.msra.mxu0 %v1835_v52  ;;  %v1928_v52 = vld [vmem:[#allocation6 + $0x40] sm:$0xff]  }
  0x84   : > { %982 = vmatprep.subr.bf16.mxu0 %v1839_v53  ;;  %1024 = vmatpush2.bf16.msra.mxu1 %v1838_v54  ;;  %v1929_v53 = vld [vmem:[#allocation6] sm:$0xff]   ;;  %v436_v54 = vlaneseq }
  0x85   : > { %1025 = vmatprep.subr.bf16.mxu1 %v1842_v55 }
  0x86   : > { %v437_v55 = vshrl.u32 %v436_v54, 7 }
  0x87   : > { %983 = vmatpush2.bf16.msra.mxu0 %v1841_v56 }
  0x88   : > { %984 = vmatprep.subr.bf16.mxu0 %v1845_v57  ;;  %1026 = vmatpush2.bf16.msra.mxu1 %v1844_v58  ;;  %v438_v57 = vsub.s32 0, %v437_v55  ;;  %v434_v58 = vld [vmem:[%s2304_s2] sm:$0x3] }
  0x89   : > { %1027 = vmatprep.subr.bf16.mxu1 %v1848_v59  ;;  %v442_v59 = vsub.s32 1, %v437_v55 }
  0x8b   : > { %985 = vmatpush2.bf16.msra.mxu0 %v1847_v60 }
  0x8c   : > { %986 = vmatprep.subr.bf16.mxu0 %v1851_v61  ;;  %1028 = vmatpush2.bf16.msra.mxu1 %v1850_v62  ;;  %v439_v62 = vrot.slane %v434_v58, %v438_v57 }
  0x8d   : > { %1029 = vmatprep.subr.bf16.mxu1 %v1854_v63  ;;  %v443_v63 = vrot.slane %v434_v58, %v442_v59 }
  0x8f   : > { %987 = vmatpush2.bf16.msra.mxu0 %v1853_v0 }
  0x90   : > { %1042 = vmatprep.subr.bf16.mxu0 %v1862_v1  ;;  %1030 = vmatpush2.bf16.msra.mxu1 %v1859_v2 }
  0x91   : > { %1639 = vmatprep.subr.bf16.mxu1 %v1914_v38 }
  0x92   : > { %989 = vmatmul.mubr.bf16.vlgmr.msra.gmra.mxu0 %v1856_v3 }
  0x93   : > { %1043 = vmatpush1.bf16.msra.mxu0 %v1860_v4  ;;  %1032 = vmatmul.mubr.bf16.vlgmr.msra.gmra.mxu1 %v1863_v5 }
  0x94   : > { %1044 = vmatprep.subr.bf16.mxu0 %v1868_v6  ;;  %1074 = vmatprep.mubr.bf16.mxu0 %v1913_v8 }
  0x95   : > { %1640 = vmatpush3.bf16.msra.mxu1 %v1915_v39 }
  0x96   : > { %1641 = vmatprep.subr.bf16.mxu1 %v1916_v40 }
  0x97   : > { %1045 = vmatpush1.bf16.msra.mxu0 %v1866_v7 }
  0x98   : > { %1046 = vmatprep.subr.bf16.mxu0 %v1871_v9 }
  0x99   : > { %1642 = vmatpush3.bf16.msra.mxu1 %v1917_v41 }
  0x9a   : > { %1643 = vmatprep.subr.bf16.mxu1 %v1918_v42 }
  0x9b   : > { %1047 = vmatpush1.bf16.msra.mxu0 %v1869_v10 }
  0x9c   : > { %1048 = vmatprep.subr.bf16.mxu0 %v1874_v11 }
  0x9d   : > { %1644 = vmatpush3.bf16.msra.mxu1 %v1919_v43  ;;  %v1930_v43 = vld [vmem:[%s2307_s5 + $0x38] sm:$0xff]  }
  0x9e   : > { %1645 = vmatprep.subr.bf16.mxu1 %v1920_v44  ;;  %v2079_v44 = vmov 0.0  }
  0x9f   : > { %1049 = vmatpush1.bf16.msra.mxu0 %v1872_v12 }
  0xa0   : > { %1050 = vmatprep.subr.bf16.mxu0 %v1877_v13 }
  0xa1   : > { %1646 = vmatpush3.bf16.msra.mxu1 %v1921_v45  ;;  %v1931_v45 = vld [vmem:[%s2307_s5 + $0x30] sm:$0xff]  }
  0xa2   : > { %1647 = vmatprep.subr.bf16.mxu1 %v1922_v46  ;;  %v1932_v46 = vld [vmem:[%s2307_s5 + $0x28] sm:$0xff]  }
  0xa3   : > { %1051 = vmatpush1.bf16.msra.mxu0 %v1875_v14 }
  0xa4   : > { %1052 = vmatprep.subr.bf16.mxu0 %v1880_v15 }
  0xa5   : > { %1648 = vmatpush3.bf16.msra.mxu1 %v1923_v47  ;;  %v1933_v47 = vld [vmem:[%s2307_s5 + $0x20] sm:$0xff]  }
  0xa6   : > { %1649 = vmatprep.subr.bf16.mxu1 %v1924_v48  ;;  %v1934_v48 = vld [vmem:[%s2307_s5 + $0x18] sm:$0xff]  }
  0xa7   : > { %1053 = vmatpush1.bf16.msra.mxu0 %v1878_v16 }
  0xa8   : > { %1054 = vmatprep.subr.bf16.mxu0 %v1883_v17 }
  0xa9   : > { %1650 = vmatpush3.bf16.msra.mxu1 %v1925_v49  ;;  %v1935_v49 = vld [vmem:[%s2307_s5 + $0x10] sm:$0xff]  }
  0xaa   : > { %1651 = vmatprep.subr.bf16.mxu1 %v1926_v50  ;;  %v1936_v50 = vld [vmem:[%s2307_s5 + $0x8] sm:$0xff]  }
  0xab   : > { %1055 = vmatpush1.bf16.msra.mxu0 %v1881_v18 }
  0xac   : > { %1056 = vmatprep.subr.bf16.mxu0 %v1886_v19 }
  0xad   : > { %1652 = vmatpush3.bf16.msra.mxu1 %v1927_v51  ;;  %v1937_v51 = vld [vmem:[%s2307_s5] sm:$0xff]  }
  0xae   : > { %1653 = vmatprep.subr.bf16.mxu1 %v1928_v52 }
  0xaf   : > { %1057 = vmatpush1.bf16.msra.mxu0 %v1884_v20 }
  0xb0   : > { %1058 = vmatprep.subr.bf16.mxu0 %v1889_v21 }
  0xb1   : > { %1654 = vmatpush3.bf16.msra.mxu1 %v1929_v53  ;;  %v1611_v53 = vld [vmem:[%s2306_s4] ss:$0 sm:$0xff] }
  0xb2   : > { %1670 = vmatprep.subr.bf16.mxu1 %v2079_v44 }
  0xb3   : > { %1059 = vmatpush2.bf16.msra.mxu0 %v1887_v22 }
  0xb4   : > { %1060 = vmatprep.subr.bf16.mxu0 %v1892_v23 }
  0xb7   : > { %1061 = vmatpush2.bf16.msra.mxu0 %v1890_v24 }
  0xb8   : > { %1062 = vmatprep.subr.bf16.mxu0 %v1895_v25 }
  0xbb   : > { %1063 = vmatpush2.bf16.msra.mxu0 %v1893_v26 }
  0xbc   : > { %1064 = vmatprep.subr.bf16.mxu0 %v1898_v27 }
  0xbf   : > { %1065 = vmatpush2.bf16.msra.mxu0 %v1896_v28 }
  0xc0   : > { %1066 = vmatprep.subr.bf16.mxu0 %v1901_v29 }
  0xc3   : > { %1067 = vmatpush2.bf16.msra.mxu0 %v1899_v30 }
  0xc4   : > { %1068 = vmatprep.subr.bf16.mxu0 %v1904_v31 }
  0xc7   : > { %1069 = vmatpush2.bf16.msra.mxu0 %v1902_v32 }
  0xc8   : > { %1070 = vmatprep.subr.bf16.mxu0 %v1907_v33 }
  0xcb   : > { %1071 = vmatpush2.bf16.msra.mxu0 %v1905_v34 }
  0xcc   : > { %1072 = vmatprep.subr.bf16.mxu0 %v1910_v35 }
  0xcf   : > { %1073 = vmatpush2.bf16.msra.mxu0 %v1908_v36 }
  0xd2   : > { %1075 = vmatmul.mubr.bf16.vlgmr.msra.gmra.mxu0 %v1911_v37 }
 0x152   : > { %v990_v56 = vpop.f32.mrf.mxu0 }
 0x153   : > { %v1033_v61 = vpop.f32.mrf.mxu1  ;;  %v991_v2 = vadd.f32 %v990_v56, %v439_v62 }
 0x154   : > { %v992_v60 = vpop.f32.mrf.mxu0 }
 0x155   : > { %v1035_v1 = vpop.f32.mrf.mxu1  ;;  %v993_v3 = vadd.f32 %v992_v60, %v443_v63  ;;  %v1034_v6 = vadd.f32 %v1033_v61, %v991_v2 }
 0x156   : > { %v994_v0 = vpop.f32.mrf.mxu0 }
 0x157   : > { %v1037_v5 = vpop.f32.mrf.mxu1  ;;  %v995_v7 = vadd.f32 %v994_v0, %v439_v62  ;;  %v1036_v9 = vadd.f32 %v1035_v1, %v993_v3 }
 0x158   : > { %v996_v4 = vpop.f32.mrf.mxu0 }
 0x159   : > { %v997_v10 = vadd.f32 %v996_v4, %v443_v63  ;;  %v1039_v12 = vpop.f32.mrf.mxu1  ;;  %v1038_v14 = vadd.f32 %v1037_v5, %v995_v7 }
 0x15b   : > { %v1040_v18 = vadd.f32 %v1039_v12, %v997_v10 }
 0x192   : > { %v1076_v8 = vpop.f32.mrf.mxu0 }
 0x193   : > { %v1077_v11 = vadd.f32 %v1076_v8, %v1034_v6  ;;  %v1628_v8 = vld [vmem:[%s2308_s6] ss:$0 sm:$0xff] }
 0x194   : > { %v1078_v13 = vpop.f32.mrf.mxu0 }
 0x195   : > { %v1079_v15 = vadd.f32 %v1078_v13, %v1036_v9  ;;  %v1089_v16 = vmul.f32 0.70710677, %v1077_v11  ;;  %v1085_v36 = vmul.f32 0.5, %v1077_v11 }
 0x196   : > { %v1080_v17 = vpop.f32.mrf.mxu0 }
 0x197   : > { %v1090_v19 = vmul.f32 0.70710677, %v1079_v15  ;;  %v1081_v20 = vadd.f32 %v1080_v17, %v1038_v14  ;;  %v1086_v33 = vmul.f32 0.5, %v1079_v15 }
 0x198   : > { %v1082_v21 = vpop.f32.mrf.mxu0 }
 0x199   : > { %1938 = verf.f32 %v1090_v19  ;;  %v1091_v22 = vmul.f32 0.70710677, %v1081_v20  ;;  %v1083_v23 = vadd.f32 %v1082_v21, %v1040_v18  ;;  %v1087_v32 = vmul.f32 0.5, %v1081_v20 }
 0x19a   : > { %1940 = verf.f32 %v1089_v16 }
 0x19b   : > { %1942 = verf.f32 %v1091_v22  ;;  %v1092_v24 = vmul.f32 0.70710677, %v1083_v23  ;;  %v1088_v34 = vmul.f32 0.5, %v1083_v23 }
 0x19d   : > { %1944 = verf.f32 %v1092_v24 }
 0x1a6   : > { %v1939_v25 = vpop.eup %1938 }
 0x1a7   : > { %v1941_v26 = vpop.eup %1940  ;;  %v1098_v28 = vadd.f32 1.0, %v1939_v25 }
 0x1a8   : > { %v1943_v27 = vpop.eup %1942  ;;  %v1097_v31 = vadd.f32 1.0, %v1941_v26 }
 0x1a9   : > { %v1099_v29 = vadd.f32 1.0, %v1943_v27  ;;  %v1102_v38 = vmul.f32 %v1098_v28, %v1086_v33 }
 0x1aa   : > { %v1945_v30 = vpop.eup %1944  ;;  %v1101_v40 = vmul.f32 %v1097_v31, %v1085_v36 }
 0x1ab   : > { %v1100_v35 = vadd.f32 1.0, %v1945_v30  ;;  %v1103_v37 = vmul.f32 %v1099_v29, %v1087_v32 }
 0x1ad   : > { %v1104_v39 = vmul.f32 %v1100_v35, %v1088_v34  ;;  %v1105_v42 = vpack.c.bf16 %v1103_v37, %v1101_v40 }
 0x1af   : > { %v1106_v41 = vpack.c.bf16 %v1104_v39, %v1102_v38 }
 0x1b1   : > { %1274 = vmatprep.mubr.bf16.mxu1 %v1106_v41 }
 0x1b2   : > { %1275 = vmatmul.mubr.bf16.vlgmr.msra.gmra.mxu1 %v1105_v42 }
 0x1b3   : > { %1671 = vmatpush3.bf16.msra.mxu1 %v1930_v43  ;;  %1686 = vmatprep.mubr.msk.bf16.mxu1 %vm2080_vm0, %v2079_v44 }
 0x1b4   : > { %1672 = vmatprep.subr.bf16.mxu1 %v2079_v44 }
 0x1b7   : > { %1673 = vmatpush3.bf16.msra.mxu1 %v1931_v45 }
 0x1b8   : > { %1674 = vmatprep.subr.bf16.mxu1 %v2079_v44 }
 0x1bb   : > { %1675 = vmatpush3.bf16.msra.mxu1 %v1932_v46 }
 0x1bc   : > { %1676 = vmatprep.subr.bf16.mxu1 %v2079_v44 }
 0x1bf   : > { %1677 = vmatpush3.bf16.msra.mxu1 %v1933_v47 }
 0x1c0   : > { %1678 = vmatprep.subr.bf16.mxu1 %v2079_v44 }
 0x1c3   : > { %1679 = vmatpush3.bf16.msra.mxu1 %v1934_v48 }
 0x1c4   : > { %1680 = vmatprep.subr.bf16.mxu1 %v2079_v44 }
 0x1c7   : > { %1681 = vmatpush3.bf16.msra.mxu1 %v1935_v49 }
 0x1c8   : > { %1682 = vmatprep.subr.bf16.mxu1 %v2079_v44 }
 0x1cb   : > { %1683 = vmatpush3.bf16.msra.mxu1 %v1936_v50 }
 0x1cc   : > { %1684 = vmatprep.subr.bf16.mxu1 %v2079_v44 }
 0x1cf   : > { %1685 = vmatpush3.bf16.msra.mxu1 %v1937_v51 }
 0x272   : > { %v1655_v52 = vpop.f32.mrf.mxu1 }
 0x274   : > { %v1656_v54 = vpop.f32.mrf.mxu1 }
 0x275   : > { %v1657_v55 = vadd.f32 %v1656_v54, %v1655_v52 }
 0x276   : > { %v1658_v56 = vpop.f32.mrf.mxu1 }
 0x277   : > { %v1277_v57 = vadd.f32 %v1657_v55, %v1611_v53 }
 0x278   : > { %v1659_v58 = vpop.f32.mrf.mxu1 }
 0x279   : > { %v1285_v59 = vmul.f32 0.70710677, %v1277_v57  ;;  %v1660_v60 = vadd.f32 %v1659_v58, %v1658_v56  ;;  %v1283_v2 = vmul.f32 0.5, %v1277_v57 }
 0x27b   : > { %1946 = verf.f32 %v1285_v59  ;;  %v1280_v61 = vadd.f32 %v1660_v60, %v1611_v53 }
 0x27d   : > { %v1286_v62 = vmul.f32 0.70710677, %v1280_v61  ;;  %v1284_v3 = vmul.f32 0.5, %v1280_v61 }
 0x27f   : > { %1948 = verf.f32 %v1286_v62 }
 0x288   : > { %v1947_v63 = vpop.eup %1946 }
 0x289   : > { %v1289_v0 = vadd.f32 1.0, %v1947_v63 }
 0x28b   : > { %v1291_v5 = vmul.f32 %v1289_v0, %v1283_v2 }
 0x28c   : > { %v1949_v1 = vpop.eup %1948 }
 0x28d   : > { %v1290_v4 = vadd.f32 1.0, %v1949_v1 }
 0x28f   : > { %v1292_v6 = vmul.f32 %v1290_v4, %v1284_v3 }
 0x291   : > { %v1293_v7 = vpack.c.bf16 %v1292_v6, %v1291_v5 }
 0x293   : > { %1687 = vmatmul.mubr.bf16.vlgmr.msra.gmra.mxu1 %v1293_v7 }
 0x353   : > { %v1399_v9 = vpop.f32.mrf.mxu1 }
 0x354   : > { %v1400_v10 = vadd.f32 %v1628_v8, %v1399_v9 }
 0x355   : > { %v1688_v11 = vpop.f32.mrf.mxu1 }
 0x356   : > { %1407 = vst.msk [vmem:[%s329_s17] sm:$0xff] %vm1406_vm1, %v1400_v10 }
 0x357   : > { %v1402_v12 = vpop.f32.mrf.mxu1 }
 0x358   : > { %v1403_v13 = vadd.f32 %v1628_v8, %v1402_v12 }
 0x359   : > { %v1689_v14 = vpop.f32.mrf.mxu1 }
 0x35a   : > { %1408 = vst.msk [vmem:[%s329_s17 + $0x8] sm:$0xff] %vm1406_vm1, %v1403_v13 }
 0x35b PF: > { %s2322_s27 = smov %s2186_s24  ;;  %p18_p10 = scmp.ge.s32.totalorder %s2186_s24, 4  }
 0x35c   : > { %s2323_s24 = smov %s2060_s25  ;;  %s2324_s25 = smov %s2064_s26 }
 0x35d   : > { %s2325_s26 = smov %s2195_s12  ;;  %20 = sbr.rel (!%p18_p10) target bundleno = 4 (0x4), region = 96 }
 0x362   :  { %1431 = vsyncpa [#allocation3], 1 }
 0x363   :  { %1433 = vsyncpa [#allocation3 + $0x1], 1 }
 0x364   :  { %1434 = vsyncpa [#allocation5], 1 }

</bundles_post_ra>
